<compile_context>
chip_gen: v5e
topology: v5e:2x2
jax: 0.10.0
libtpu: 0.0.40
codegen_flags: <defaults>
</compile_context>

<pallas_src>
import jax
import jax.numpy as jnp
from jax.experimental import pallas as pl
from jax.experimental.pallas import tpu as pltpu

D = 30            # dim_of_data == down_out_dims (forced by the forward pass)
DEPTH = 3         # number of transformer blocks
PRED_DIMS = 2     # Propensity_net_NN.ps_out out_features
N_BLK_PARAMS = 19 # scalar params per block (embed_dim = 1 => everything is tiny)
LN_EPS = 1e-6
N_SLABS = 4       # fused-down/weight, fc1, fc2, ps_out


def _encoder_kernel(x_ref, w_ref, b_ref, emb_ref, pred_ref):
    """Feature-major epilogue: x_ref (D, TILE_N); lane dim = batch (lane-dense).

    w_ref: (4, D, D) weight slab  [W_fused^T, fc1_w^T, fc2_w^T, pad(ps_w^T)]
    b_ref: (4, D, 1) bias slab    [B_fused^T, fc1_b^T, fc2_b^T, pad(ps_b^T)]
    """
    xT = x_ref[...]                                                   # (D, TILE_N)
    # embedding = (x + delta) @ w_down @ w_mat  (delta/bias folded into slab 0)
    emb = jnp.dot(w_ref[0], xT, preferred_element_type=jnp.float32) + b_ref[0]
    emb_ref[...] = emb
    # Propensity_net_NN (phase='train'): relu(fc1) -> relu(fc2) -> ps_out
    h = jnp.maximum(
        jnp.dot(w_ref[1], emb, preferred_element_type=jnp.float32) + b_ref[1], 0.0)
    h = jnp.maximum(
        jnp.dot(w_ref[2], h, preferred_element_type=jnp.float32) + b_ref[2], 0.0)
    full = jnp.dot(w_ref[3], h, preferred_element_type=jnp.float32) + b_ref[3]
    pred_ref[...] = full[:PRED_DIMS, :]                               # (2, TILE_N)


def transformer_encoder_forward(x, p, tile_n=256):
    """x: (N, 1, D) -> (embedding (N, 1, D), prediction (N, 1, 2))."""
    n = x.shape[0]
    x2d = x[:, 0, :].astype(jnp.float32)                              # (N, D)

    # ---- constant-fold the block tower (LayerNorm over size-1 embed dim => n = beta) ----
    blk = p["blk"]                                                    # (DEPTH, 19)
    b1, wv, bv = blk[:, 1], blk[:, 4], blk[:, 7]
    wp, bp, b2 = blk[:, 8], blk[:, 9], blk[:, 11]
    w1a, w1b, c1a, c1b = blk[:, 12], blk[:, 13], blk[:, 14], blk[:, 15]
    w2a, w2b, c2 = blk[:, 16], blk[:, 17], blk[:, 18]
    # per block: a_out == v (uniform softmax over identical scores), MLP is scalar
    delta = jnp.sum((b1 * wv + bv) * wp + bp
                    + jax.nn.gelu(b2 * w1a + c1a, approximate=False) * w2a
                    + jax.nn.gelu(b2 * w1b + c1b, approximate=False) * w2b
                    + c2)

    # ---- fuse down Linear with the `@ weight` matmul, absorbing delta into the bias ----
    w_fused = p["w_down"] @ p["w_mat"]                                # (D, D)
    b_fused = (delta * jnp.sum(p["w_down"], axis=0, keepdims=True)
               + p["b_down"]) @ p["w_mat"]                            # (1, D)

    # ---- pack parameters into two resident slabs (2 DMA descriptors total) ----
    ps_wT = jnp.zeros((D, D), jnp.float32).at[:PRED_DIMS, :].set(p["ps_w"].T)
    ps_bT = jnp.zeros((D, 1), jnp.float32).at[:PRED_DIMS, :].set(p["ps_b"].T)
    wslab = jnp.stack([w_fused.T, p["fc1_w"].T, p["fc2_w"].T, ps_wT])   # (4, D, D)
    bslab = jnp.stack([b_fused.T, p["fc1_b"].T, p["fc2_b"].T, ps_bT])   # (4, D, 1)

    # ---- feature-major layout: batch on the lane axis, tiled over a parallel grid ----
    n_pad = pl.cdiv(n, tile_n) * tile_n
    xT = jnp.zeros((D, n_pad), jnp.float32).at[:, :n].set(x2d.T)

    embT, predT = pl.pallas_call(
        _encoder_kernel,
        out_shape=(jax.ShapeDtypeStruct((D, n_pad), jnp.float32),
                   jax.ShapeDtypeStruct((PRED_DIMS, n_pad), jnp.float32)),
        grid=(n_pad // tile_n,),
        in_specs=[pl.BlockSpec((D, tile_n), lambda i: (0, i)),
                  pl.BlockSpec((N_SLABS, D, D), lambda i: (0, 0, 0)),
                  pl.BlockSpec((N_SLABS, D, 1), lambda i: (0, 0, 0))],
        out_specs=(pl.BlockSpec((D, tile_n), lambda i: (0, i)),
                   pl.BlockSpec((PRED_DIMS, tile_n), lambda i: (0, i))),
        compiler_params=pltpu.CompilerParams(dimension_semantics=("parallel",)),
    )(xT, wslab, bslab)

    emb = embT[:, :n].T[:, None, :]                                   # (N, 1, D)
    pred = predT[:, :n].T[:, None, :]                                 # (N, 1, 2)
    return emb, pred


def reference_forward(x, p):
    """Pure-JAX reference mirroring the PyTorch forward (for correctness check)."""
    xs = x[:, 0, :].astype(jnp.float32)
    inv = LN_EPS ** -0.5
    for d in range(DEPTH):
        b = p["blk"][d]
        n1 = b[0] * ((xs - xs) * inv) + b[1]
        q = n1 * b[2] + b[5]
        k = n1 * b[3] + b[6]
        v = n1 * b[4] + b[7]
        attn = jax.nn.softmax(q[:, :, None] * k[:, None, :], axis=-1)
        a_out = jnp.sum(attn * v[:, None, :], axis=-1)
        xs = xs + a_out * b[8] + b[9]
        n2 = b[10] * ((xs - xs) * inv) + b[11]
        h0 = jax.nn.gelu(n2 * b[12] + b[14], approximate=False)
        h1 = jax.nn.gelu(n2 * b[13] + b[15], approximate=False)
        xs = xs + h0 * b[16] + h1 * b[17] + b[18]
    emb = xs @ p["w_down"] + p["b_down"]
    emb = emb @ p["w_mat"]
    h = jax.nn.relu(emb @ p["fc1_w"] + p["fc1_b"])
    h = jax.nn.relu(h @ p["fc2_w"] + p["fc2_b"])
    pred = h @ p["ps_w"] + p["ps_b"]
    return emb[:, None, :], pred[:, None, :]


def init_params(key):
    ks = jax.random.split(key, 10)

    def xavier(k, fan_in, fan_out):
        bound = (6.0 / (fan_in + fan_out)) ** 0.5
        return jax.random.uniform(k, (fan_in, fan_out), jnp.float32, -bound, bound)

    # per-block scalar params (embed_dim = 1):
    # [g1, b1, wq, wk, wv, bq, bk, bv, w_proj, b_proj, g2, b2,
    #  w_fc1_0, w_fc1_1, b_fc1_0, b_fc1_1, w_fc2_0, w_fc2_1, b_fc2]
    blk = jax.random.uniform(ks[0], (DEPTH, N_BLK_PARAMS), jnp.float32, -0.5, 0.5)
    blk = blk.at[:, 0].set(1.0).at[:, 10].set(1.0)   # LayerNorm gammas = 1 (PyTorch default)

    return dict(
        blk=blk,
        w_down=xavier(ks[1], D, D),                                          # down.weight^T
        b_down=jax.random.uniform(ks[2], (1, D), jnp.float32, -0.1, 0.1),    # down.bias
        w_mat=jax.random.uniform(ks[3], (D, D), jnp.float32, 0.0, 1.0),      # torch.rand weight
        fc1_w=xavier(ks[4], D, D),                                           # ps.fc1 (xavier)
        fc1_b=jax.random.uniform(ks[5], (1, D), jnp.float32, -0.1, 0.1),
        fc2_w=xavier(ks[6], D, D),                                           # ps.fc2 (xavier)
        fc2_b=jax.random.uniform(ks[7], (1, D), jnp.float32, -0.1, 0.1),
        ps_w=xavier(ks[8], D, PRED_DIMS),                                    # ps.ps_out
        ps_b=jax.random.uniform(ks[9], (1, PRED_DIMS), jnp.float32, -0.1, 0.1),
    )


if __name__ == "__main__":
    key = jax.random.PRNGKey(0)
    k_x, k_p = jax.random.split(key)
    N = 16
    x = jax.random.normal(k_x, (N, 1, D), dtype=jnp.float32)   # (n_samples, 1, dim_of_data)
    params = init_params(k_p)

    emb, pred = transformer_encoder_forward(x, params)
    jax.block_until_ready((emb, pred))

    emb_ref, pred_ref = reference_forward(x, params)
    assert emb.shape == (N, 1, D) and pred.shape == (N, 1, PRED_DIMS)
    assert jnp.allclose(emb, emb_ref, atol=1e-4, rtol=1e-4)
    assert jnp.allclose(pred, pred_ref, atol=1e-4, rtol=1e-4)

    print("KERNEL_OK")
</pallas_src>

<mosaic_0001>
module attributes {stable_mosaic.version = 11 : i64} {
  func.func @_encoder_kernel(%arg0: i32, %arg1: memref<30x256xf32, #tpu.memory_space<vmem>>, %arg2: memref<4x30x30xf32, #tpu.memory_space<vmem>>, %arg3: memref<4x30x1xf32, #tpu.memory_space<vmem>>, %arg4: memref<30x256xf32, #tpu.memory_space<vmem>>, %arg5: memref<2x256xf32, #tpu.memory_space<vmem>>) attributes {dimension_semantics = [#tpu.dimension_semantics<parallel>], iteration_bounds = array<i64: 1>, scalar_prefetch = 0 : i64, scratch_operands = 0 : i64, tpu.core_type = #tpu.core_type<tc>, window_params = [{transform_indices = @transform_0, window_bounds = array<i64: 30, 256>}, {pipeline_mode = #tpu.pipeline_mode<synchronous>, transform_indices = @transform_1, window_bounds = array<i64: 4, 30, 30>}, {pipeline_mode = #tpu.pipeline_mode<synchronous>, transform_indices = @transform_2, window_bounds = array<i64: 4, 30, 1>}, {transform_indices = @transform_3, window_bounds = array<i64: 30, 256>}, {transform_indices = @transform_4, window_bounds = array<i64: 2, 256>}]} {
    %c0 = arith.constant 0 : index
    %c0_0 = arith.constant 0 : index
    %0 = vector.load %arg1[%c0, %c0_0] : memref<30x256xf32, #tpu.memory_space<vmem>>, vector<30x256xf32>
    %c0_1 = arith.constant 0 : index
    %c0_2 = arith.constant 0 : index
    %c0_3 = arith.constant 0 : index
    %1 = vector.load %arg2[%c0_1, %c0_2, %c0_3] : memref<4x30x30xf32, #tpu.memory_space<vmem>>, vector<1x30x30xf32>
    %2 = vector.shape_cast %1 : vector<1x30x30xf32> to vector<30x30xf32>
    %cst = arith.constant dense<0.000000e+00> : vector<30x256xf32>
    %3 = tpu.matmul %2, %0, %cst {dimension_numbers = #tpu.dot_dimension_numbers<[1], [0], [0], [1], [0, 0, 1, 1], [], []>} : vector<30x30xf32>, vector<30x256xf32>, vector<30x256xf32> -> vector<30x256xf32>
    %c0_4 = arith.constant 0 : index
    %c0_5 = arith.constant 0 : index
    %c0_6 = arith.constant 0 : index
    %4 = vector.load %arg3[%c0_4, %c0_5, %c0_6] : memref<4x30x1xf32, #tpu.memory_space<vmem>>, vector<1x30x1xf32>
    %5 = vector.shape_cast %4 : vector<1x30x1xf32> to vector<30x1xf32>
    %6 = vector.broadcast %5 : vector<30x1xf32> to vector<30x256xf32>
    %7 = arith.addf %3, %6 : vector<30x256xf32>
    %c0_7 = arith.constant 0 : index
    %c0_8 = arith.constant 0 : index
    %8 = vector.load %arg4[%c0_7, %c0_8] : memref<30x256xf32, #tpu.memory_space<vmem>>, vector<30x256xf32>
    tpu.vector_store %arg4[%c0_7, %c0_8], %7 {strides = array<i32>} : memref<30x256xf32, #tpu.memory_space<vmem>>, vector<30x256xf32>,
    %c1 = arith.constant 1 : index
    %c0_9 = arith.constant 0 : index
    %c0_10 = arith.constant 0 : index
    %9 = vector.load %arg2[%c1, %c0_9, %c0_10] : memref<4x30x30xf32, #tpu.memory_space<vmem>>, vector<1x30x30xf32>
    %10 = vector.shape_cast %9 : vector<1x30x30xf32> to vector<30x30xf32>
    %cst_11 = arith.constant dense<0.000000e+00> : vector<30x256xf32>
    %11 = tpu.matmul %10, %7, %cst_11 {dimension_numbers = #tpu.dot_dimension_numbers<[1], [0], [0], [1], [0, 0, 1, 1], [], []>} : vector<30x30xf32>, vector<30x256xf32>, vector<30x256xf32> -> vector<30x256xf32>
    %c1_12 = arith.constant 1 : index
    %c0_13 = arith.constant 0 : index
    %c0_14 = arith.constant 0 : index
    %12 = vector.load %arg3[%c1_12, %c0_13, %c0_14] : memref<4x30x1xf32, #tpu.memory_space<vmem>>, vector<1x30x1xf32>
    %13 = vector.shape_cast %12 : vector<1x30x1xf32> to vector<30x1xf32>
    %14 = vector.broadcast %13 : vector<30x1xf32> to vector<30x256xf32>
    %15 = arith.addf %11, %14 : vector<30x256xf32>
    %cst_15 = arith.constant 0.000000e+00 : f32
    %16 = vector.broadcast %cst_15 : f32 to vector<30x256xf32>
    %17 = arith.maximumf %15, %16 : vector<30x256xf32>
    %c2 = arith.constant 2 : index
    %c0_16 = arith.constant 0 : index
    %c0_17 = arith.constant 0 : index
    %18 = vector.load %arg2[%c2, %c0_16, %c0_17] : memref<4x30x30xf32, #tpu.memory_space<vmem>>, vector<1x30x30xf32>
    %19 = vector.shape_cast %18 : vector<1x30x30xf32> to vector<30x30xf32>
    %cst_18 = arith.constant dense<0.000000e+00> : vector<30x256xf32>
    %20 = tpu.matmul %19, %17, %cst_18 {dimension_numbers = #tpu.dot_dimension_numbers<[1], [0], [0], [1], [0, 0, 1, 1], [], []>} : vector<30x30xf32>, vector<30x256xf32>, vector<30x256xf32> -> vector<30x256xf32>
    %c2_19 = arith.constant 2 : index
    %c0_20 = arith.constant 0 : index
    %c0_21 = arith.constant 0 : index
    %21 = vector.load %arg3[%c2_19, %c0_20, %c0_21] : memref<4x30x1xf32, #tpu.memory_space<vmem>>, vector<1x30x1xf32>
    %22 = vector.shape_cast %21 : vector<1x30x1xf32> to vector<30x1xf32>
    %23 = vector.broadcast %22 : vector<30x1xf32> to vector<30x256xf32>
    %24 = arith.addf %20, %23 : vector<30x256xf32>
    %cst_22 = arith.constant 0.000000e+00 : f32
    %25 = vector.broadcast %cst_22 : f32 to vector<30x256xf32>
    %26 = arith.maximumf %24, %25 : vector<30x256xf32>
    %c3 = arith.constant 3 : index
    %c0_23 = arith.constant 0 : index
    %c0_24 = arith.constant 0 : index
    %27 = vector.load %arg2[%c3, %c0_23, %c0_24] : memref<4x30x30xf32, #tpu.memory_space<vmem>>, vector<1x30x30xf32>
    %28 = vector.shape_cast %27 : vector<1x30x30xf32> to vector<30x30xf32>
    %cst_25 = arith.constant dense<0.000000e+00> : vector<30x256xf32>
    %29 = tpu.matmul %28, %26, %cst_25 {dimension_numbers = #tpu.dot_dimension_numbers<[1], [0], [0], [1], [0, 0, 1, 1], [], []>} : vector<30x30xf32>, vector<30x256xf32>, vector<30x256xf32> -> vector<30x256xf32>
    %c3_26 = arith.constant 3 : index
    %c0_27 = arith.constant 0 : index
    %c0_28 = arith.constant 0 : index
    %30 = vector.load %arg3[%c3_26, %c0_27, %c0_28] : memref<4x30x1xf32, #tpu.memory_space<vmem>>, vector<1x30x1xf32>
    %31 = vector.shape_cast %30 : vector<1x30x1xf32> to vector<30x1xf32>
    %32 = vector.broadcast %31 : vector<30x1xf32> to vector<30x256xf32>
    %33 = arith.addf %29, %32 : vector<30x256xf32>
    %34 = vector.extract_strided_slice %33 {offsets = [0, 0], sizes = [2, 256], strides = [1, 1]} : vector<30x256xf32> to vector<2x256xf32>
    %c0_29 = arith.constant 0 : index
    %c0_30 = arith.constant 0 : index
    %35 = vector.load %arg5[%c0_29, %c0_30] : memref<2x256xf32, #tpu.memory_space<vmem>>, vector<2x256xf32>
    tpu.vector_store %arg5[%c0_29, %c0_30], %34 {strides = array<i32>} : memref<2x256xf32, #tpu.memory_space<vmem>>, vector<2x256xf32>,
    return
  }
  func.func @transform_0(%arg0: i32) -> (i32, i32) {
    %c0_i32 = arith.constant 0 : i32
    %c0_i32_0 = arith.constant 0 : i32
    return %c0_i32, %arg0 : i32, i32
  }
  func.func @transform_1(%arg0: i32) -> (i32, i32, i32) {
    %c0_i32 = arith.constant 0 : i32
    %c0_i32_0 = arith.constant 0 : i32
    %c0_i32_1 = arith.constant 0 : i32
    %c0_i32_2 = arith.constant 0 : i32
    return %c0_i32, %c0_i32_0, %c0_i32_1 : i32, i32, i32
  }
  func.func @transform_2(%arg0: i32) -> (i32, i32, i32) {
    %c0_i32 = arith.constant 0 : i32
    %c0_i32_0 = arith.constant 0 : i32
    %c0_i32_1 = arith.constant 0 : i32
    %c0_i32_2 = arith.constant 0 : i32
    return %c0_i32, %c0_i32_0, %c0_i32_1 : i32, i32, i32
  }
  func.func @transform_3(%arg0: i32) -> (i32, i32) {
    %c0_i32 = arith.constant 0 : i32
    %c0_i32_0 = arith.constant 0 : i32
    return %c0_i32, %arg0 : i32, i32
  }
  func.func @transform_4(%arg0: i32) -> (i32, i32) {
    %c0_i32 = arith.constant 0 : i32
    %c0_i32_0 = arith.constant 0 : i32
    return %c0_i32, %arg0 : i32, i32
  }
}

</mosaic_0001>

<bundles_post_ra>
// kernel: tpu_custom_call.1
= control target key start
LH: loop header
LB: loop body
LE: loop exit
PB: predicated region body
PF: predicated region fallthrough
CT: control target
= control target key end

     0   :  { %10 = vsyncpa [#allocation3], 0  ;;  %vm67_vm0 = vcmask 1045504   ;;  %v630_v5 = vmov 0   ;;  %vm54_vm1 = vcmask 244736   ;;  %s817_s0 = inlined_call_operand.vmem [shape: f32[30,256], index: 0, kind: input, shape index: {}]   ;;  %s818_s1 = inlined_call_operand.vmem [shape: f32[4,30,30], index: 1, kind: input, shape index: {}]   ;;  %s819_s2 = inlined_call_operand.vmem [shape: f32[4,30,1], index: 2, kind: input, shape index: {}]   ;;  %s820_s3 = inlined_call_operand.hbm [shape: f32[30,256], index: 3, kind: output, shape index: {0}]   ;;  %s821_s4 = inlined_call_operand.hbm [shape: f32[2,256], index: 4, kind: output, shape index: {1}]  }
   0x1   :  { %v24_v0 = vld [vmem:[%s817_s0 + $0x30] sm:$0x3f]  ;;  %v25_v1 = vld [vmem:[%s817_s0 + $0x38] sm:$0x3f]  ;;  %v22_v2 = vld [vmem:[%s817_s0 + $0x20] sm:$0xff]  ;;  %575 = vset.pattern.permute.xlu0 %v630_v5  ;;  %576 = vset.pattern.permute.xlu1 %v630_v5 }
   0x2   :  { %506 = vmatpush.msk.msra.mxu0 %vm67_vm0, %v24_v0  ;;  %511 = vmatpush.msk.msra.mxu1 %vm67_vm0, %v25_v1  ;;  %v23_v3 = vld [vmem:[%s817_s0 + $0x28] sm:$0xff]  ;;  %v33_v4 = vld [vmem:[%s819_s2 + $0x18] sm:$0x3f]  ;;  %v20_v6 = vld [vmem:[%s817_s0 + $0x10] sm:$0xff] }
   0x3   :  { %v21_v7 = vld [vmem:[%s817_s0 + $0x18] sm:$0xff]  ;;  %v31_v8 = vld [vmem:[%s819_s2 + $0x8] sm:$0xff]  ;;  %51 = vperm.xlu0 %575, %v33_v4   ;;  %v18_v9 = vld [vmem:[%s817_s0] sm:$0xff]  ;;  %577 = vset.pattern.permute.xlu2 %v630_v5 }
   0x4   :  { %87 = vmatpush.msra.mxu0 %v22_v2  ;;  %116 = vmatpush.msra.mxu1 %v23_v3  ;;  %v19_v10 = vld [vmem:[%s817_s0 + $0x8] sm:$0xff]  ;;  %v26_v11 = vld [vmem:[%s818_s1] sm:$0xff] }
   0x5   :  { %41 = vperm.xlu1 %576, %v31_v8  }
   0x6   :  { %88 = vmatpush.msra.mxu0 %v20_v6  ;;  %117 = vmatpush.msra.mxu1 %v21_v7 }
   0x8   :  { %89 = vmatpush.msra.mxu0 %v18_v9  ;;  %118 = vmatpush.msra.mxu1 %v19_v10 }
   0x9   :  { %11 = vsyncpa [#allocation5], 0  ;;  %507 = vmatmul.msk.f32.vlgmr.msra.gmra.mxu0 %vm54_vm1, %v26_v11  ;;  %512 = vmatmul.msk.f32.vlgmr.msra.gmra.mxu1 %vm54_vm1, %v26_v11  ;;  %v32_v12 = vld [vmem:[%s819_s2 + $0x10] sm:$0xff]  ;;  %v30_v13 = vld [vmem:[%s819_s2] sm:$0xff]  ;;  %s631_s8 = smov [#allocation2]   ;;  %s478_s12 = sshll.u32 %s820_s3, 4  ;;  %s479_s12 = int_to_ptr.hbm [resolvable:$true] %s478_s12 }
   0xa   :  { %v27_v14 = vld [vmem:[%s818_s1 + $0x8] sm:$0xff]  ;;  %v520_v16 = vld [vmem:[%s819_s2 + $0x20] sm:$0xff]  ;;  %v28_v17 = vld [vmem:[%s818_s1 + $0x10] sm:$0xff]  ;;  %s476_s9 = sshll.u32 %s631_s8, 4  ;;  %s632_s0 = smov 256   ;;  %vm468_vm2 = vcmask 1041408   ;;  %s477_s9 = int_to_ptr.vmem [resolvable:$true] %s476_s9 }
   0xb   :  { %46 = vperm.xlu0 %575, %v32_v12   ;;  %v521_v15 = vld [vmem:[%s819_s2 + $0x28] sm:$0xff]  ;;  %v540_v18 = vld [vmem:[%s819_s2 + $0x50] sm:$0xff]  ;;  %v29_v20 = vld [vmem:[%s818_s1 + $0x18] sm:$0x3f]  ;;  %s633_s13 = smov 16   ;;  %s492_s17 = sshll.u32 %s821_s4, 4  ;;  %s493_s17 = int_to_ptr.hbm [resolvable:$true] %s492_s17 }
   0xc   :  { %v539_v19 = vld [vmem:[%s819_s2 + $0x48] sm:$0xff]  ;;  %v556_v21 = vld [vmem:[%s819_s2 + $0x60] sm:$0xff]  ;;  %v523_v42 = vld [vmem:[%s819_s2 + $0x38] sm:$0x3f] }
   0xd   :  { %36 = vperm.xlu1 %576, %v30_v13   ;;  %167 = vperm.xlu2 %577, %v523_v42   ;;  %v516_v43 = vld [vmem:[%s818_s1 + $0x20] sm:$0xff]  ;;  %v522_v44 = vld [vmem:[%s819_s2 + $0x30] sm:$0xff]  ;;  %v517_v45 = vld [vmem:[%s818_s1 + $0x28] sm:$0xff] }
   0xe   :  { %v541_v46 = vld [vmem:[%s819_s2 + $0x58] sm:$0x3f]  ;;  %v518_v47 = vld [vmem:[%s818_s1 + $0x30] sm:$0xff]  ;;  %v538_v48 = vld [vmem:[%s819_s2 + $0x40] sm:$0xff] }
   0xf   :  { %v519_v49 = vld [vmem:[%s818_s1 + $0x38] sm:$0x3f] }
  0x11   :  { %508 = vmatmul.msk.f32.gmra.mxu0 %vm54_vm1, %v27_v14  ;;  %513 = vmatmul.msk.f32.gmra.mxu1 %vm54_vm1, %v27_v14  ;;  %v534_v14 = vld [vmem:[%s818_s1 + $0x40] sm:$0xff] }
  0x13   :  { %157 = vperm.xlu0 %575, %v521_v15   ;;  %v535_v15 = vld [vmem:[%s818_s1 + $0x48] sm:$0xff] }
  0x15   :  { %152 = vperm.xlu1 %576, %v520_v16   ;;  %162 = vperm.xlu2 %577, %v522_v44   ;;  %v536_v16 = vld [vmem:[%s818_s1 + $0x50] sm:$0xff] }
  0x19   :  { %509 = vmatmul.msk.f32.gmra.mxu0 %vm54_vm1, %v28_v17  ;;  %514 = vmatmul.msk.f32.gmra.mxu1 %vm54_vm1, %v28_v17  ;;  %v537_v17 = vld [vmem:[%s818_s1 + $0x58] sm:$0x3f] }
  0x1b   :  { %276 = vperm.xlu0 %575, %v540_v18  }
  0x1d   :  { %271 = vperm.xlu1 %576, %v539_v19   ;;  %281 = vperm.xlu2 %577, %v541_v46   ;;  %v552_v46 = vld [vmem:[%s818_s1 + $0x60] sm:$0xff] }
  0x21   :  { %510 = vmatmul.msk.f32.gmra.mxu0 %vm54_vm1, %v29_v20  ;;  %515 = vmatmul.msk.f32.gmra.mxu1 %vm54_vm1, %v29_v20 }
  0x23   :  { %380 = vperm.xlu0 %575, %v556_v21  }
  0x25   :  { %266 = vperm.xlu2 %577, %v538_v48   ;;  %v554_v48 = vld [vmem:[%s818_s1 + $0x70] sm:$0xff] }
  0x67   :  { %v168_v54 = vpop.permute.xlu2 %167 }
  0x6f   :  { %v163_v57 = vpop.permute.xlu2 %162 }
  0x75   :  { %v52_v28 = vpop.permute.xlu0 %51 }
  0x77   :  { %v42_v22 = vpop.permute.xlu1 %41 }
  0x7d   :  { %v47_v33 = vpop.permute.xlu0 %46 }
  0x7f   :  { %v37_v23 = vpop.permute.xlu1 %36 }
  0x85   :  { %v158_v0 = vpop.permute.xlu0 %157 }
  0x86   :  { %v91_v24 = vpop.f32.mrf.mxu0  ;;  %v120_v25 = vpop.f32.mrf.mxu1 }
  0x87   :  { %v92_v26 = vadd.f32 %v91_v24, %v37_v23  ;;  %v121_v27 = vadd.f32 %v120_v25, %v37_v23  ;;  %v153_v5 = vpop.permute.xlu1 %152  ;;  %v282_v24 = vpop.permute.xlu2 %281 }
  0x89   :  { %132 = vst [vmem:[#allocation2] sm:$0xff] %v92_v26 }
  0x8a   :  { %133 = vst [vmem:[#allocation2 + $0x8] sm:$0xff] %v121_v27 }
  0x8d   :  { %v277_v25 = vpop.permute.xlu0 %276 }
  0x8e   :  { %v94_v29 = vpop.f32.mrf.mxu0  ;;  %v123_v30 = vpop.f32.mrf.mxu1 }
  0x8f   :  { %v95_v31 = vadd.f32 %v94_v29, %v42_v22  ;;  %v124_v32 = vadd.f32 %v123_v30, %v42_v22 }
  0x91   :  { %134 = vst [vmem:[#allocation2 + $0x10] sm:$0xff] %v95_v31 }
  0x92   :  { %135 = vst [vmem:[#allocation2 + $0x18] sm:$0xff] %v124_v32 }
  0x96   :  { %v97_v34 = vpop.f32.mrf.mxu0  ;;  %v126_v35 = vpop.f32.mrf.mxu1 }
  0x97   :  { %v98_v36 = vadd.f32 %v97_v34, %v47_v33  ;;  %v127_v37 = vadd.f32 %v126_v35, %v47_v33 }
  0x99   :  { %136 = vst [vmem:[#allocation2 + $0x20] sm:$0xff] %v98_v36 }
  0x9a   :  { %137 = vst [vmem:[#allocation2 + $0x28] sm:$0xff] %v127_v37 }
  0x9e   :  { %v100_v38 = vpop.f32.mrf.mxu0  ;;  %v129_v39 = vpop.f32.mrf.mxu1 }
  0x9f   :  { %v101_v40 = vadd.f32 %v100_v38, %v52_v28  ;;  %v130_v41 = vadd.f32 %v129_v39, %v52_v28 }
  0xa1   :  { %138 = vst [vmem:[#allocation2 + $0x30] sm:$0x3f] %v101_v40  ;;  %524 = vmatpush.msk.msra.mxu2 %vm67_vm0, %v101_v40  ;;  %529 = vmatpush.msk.msra.mxu3 %vm67_vm0, %v130_v41 }
  0xa2   :  { %139 = vst [vmem:[#allocation2 + $0x38] sm:$0x3f] %v130_v41 }
  0xa3   :  { %201 = vmatpush.msra.mxu2 %v98_v36  ;;  %230 = vmatpush.msra.mxu3 %v127_v37  ;;  %v267_v37 = vpop.permute.xlu2 %266  ;;  %484 = dma.vmem_to_hbm [thread:$0]  %s477_s9, 1024, %s479_s12, [#allocation3], %s632_s0, %s632_s0, %s633_s13  }
  0xa5   :  { %202 = vmatpush.msra.mxu2 %v95_v31  ;;  %231 = vmatpush.msra.mxu3 %v124_v32  ;;  %v272_v32 = vpop.permute.xlu1 %271 }
  0xa7   :  { %203 = vmatpush.msra.mxu2 %v92_v26  ;;  %232 = vmatpush.msra.mxu3 %v121_v27 }
  0xa8   :  { %525 = vmatmul.msk.f32.vlgmr.msra.gmra.mxu2 %vm54_vm1, %v516_v43  ;;  %530 = vmatmul.msk.f32.vlgmr.msra.gmra.mxu3 %vm54_vm1, %v516_v43 }
  0xb0   :  { %526 = vmatmul.msk.f32.gmra.mxu2 %vm54_vm1, %v517_v45  ;;  %531 = vmatmul.msk.f32.gmra.mxu3 %vm54_vm1, %v517_v45 }
  0xb8   :  { %527 = vmatmul.msk.f32.gmra.mxu2 %vm54_vm1, %v518_v47  ;;  %532 = vmatmul.msk.f32.gmra.mxu3 %vm54_vm1, %v518_v47  ;;  %v553_v47 = vld [vmem:[%s818_s1 + $0x68] sm:$0xff] }
  0xc0   :  { %528 = vmatmul.msk.f32.gmra.mxu2 %vm54_vm1, %v519_v49  ;;  %533 = vmatmul.msk.f32.gmra.mxu3 %vm54_vm1, %v519_v49  ;;  %v555_v49 = vld [vmem:[%s818_s1 + $0x78] sm:$0x3f]  ;;  %s634_s1 = smov [#allocation4]  }
  0xc1   :  { %s490_s14 = sshll.u32 %s634_s1, 4  ;;  %s491_s14 = int_to_ptr.vmem [resolvable:$true] %s490_s14 }
 0x12b   :  { %v205_v50 = vpop.f32.mrf.mxu2  ;;  %v234_v51 = vpop.f32.mrf.mxu3 }
 0x12c   :  { %v206_v6 = vadd.f32 %v205_v50, %v153_v5  ;;  %v235_v7 = vadd.f32 %v234_v51, %v153_v5  ;;  %v381_v50 = vpop.permute.xlu0 %380 }
 0x12e   :  { %v246_v12 = vmax.f32 %v206_v6, 0.0  ;;  %v247_v13 = vmax.f32 %v235_v7, 0.0 }
 0x133   :  { %v208_v52 = vpop.f32.mrf.mxu2  ;;  %v237_v53 = vpop.f32.mrf.mxu3 }
 0x134   :  { %v209_v1 = vadd.f32 %v208_v52, %v158_v0  ;;  %v238_v2 = vadd.f32 %v237_v53, %v158_v0 }
 0x136   :  { %v248_v10 = vmax.f32 %v209_v1, 0.0  ;;  %v249_v11 = vmax.f32 %v238_v2, 0.0 }
 0x13b   :  { %v211_v55 = vpop.f32.mrf.mxu2  ;;  %v240_v56 = vpop.f32.mrf.mxu3 }
 0x13c   :  { %v212_v60 = vadd.f32 %v211_v55, %v163_v57  ;;  %v241_v61 = vadd.f32 %v240_v56, %v163_v57 }
 0x13e   :  { %v250_v8 = vmax.f32 %v212_v60, 0.0  ;;  %v251_v9 = vmax.f32 %v241_v61, 0.0 }
 0x143   :  { %v214_v58 = vpop.f32.mrf.mxu2  ;;  %v243_v59 = vpop.f32.mrf.mxu3 }
 0x144   :  { %v215_v62 = vadd.f32 %v214_v58, %v168_v54  ;;  %v244_v63 = vadd.f32 %v243_v59, %v168_v54 }
 0x146   :  { %v252_v3 = vmax.f32 %v215_v62, 0.0  ;;  %v253_v4 = vmax.f32 %v244_v63, 0.0 }
 0x148   :  { %542 = vmatpush.msk.msrb.mxu0 %vm67_vm0, %v252_v3  ;;  %547 = vmatpush.msk.msrb.mxu1 %vm67_vm0, %v253_v4 }
 0x14a   :  { %315 = vmatpush.msrb.mxu0 %v250_v8  ;;  %344 = vmatpush.msrb.mxu1 %v251_v9 }
 0x14c   :  { %316 = vmatpush.msrb.mxu0 %v248_v10  ;;  %345 = vmatpush.msrb.mxu1 %v249_v11 }
 0x14e   :  { %317 = vmatpush.msrb.mxu0 %v246_v12  ;;  %346 = vmatpush.msrb.mxu1 %v247_v13 }
 0x14f   :  { %543 = vmatmul.msk.f32.vlgmr.msrb.gmra.mxu0 %vm54_vm1, %v534_v14  ;;  %548 = vmatmul.msk.f32.vlgmr.msrb.gmra.mxu1 %vm54_vm1, %v534_v14 }
 0x157   :  { %544 = vmatmul.msk.f32.gmra.mxu0 %vm54_vm1, %v535_v15  ;;  %549 = vmatmul.msk.f32.gmra.mxu1 %vm54_vm1, %v535_v15 }
 0x15f   :  { %545 = vmatmul.msk.f32.gmra.mxu0 %vm54_vm1, %v536_v16  ;;  %550 = vmatmul.msk.f32.gmra.mxu1 %vm54_vm1, %v536_v16 }
 0x167   :  { %546 = vmatmul.msk.f32.gmra.mxu0 %vm54_vm1, %v537_v17  ;;  %551 = vmatmul.msk.f32.gmra.mxu1 %vm54_vm1, %v537_v17 }
 0x1cc   :  { %v319_v18 = vpop.f32.mrf.mxu0  ;;  %v348_v19 = vpop.f32.mrf.mxu1 }
 0x1cd   :  { %v320_v38 = vadd.f32 %v319_v18, %v267_v37  ;;  %v349_v39 = vadd.f32 %v348_v19, %v267_v37 }
 0x1cf   :  { %v360_v44 = vmax.f32 %v320_v38, 0.0  ;;  %v361_v45 = vmax.f32 %v349_v39, 0.0 }
 0x1d4   :  { %v322_v20 = vpop.f32.mrf.mxu0  ;;  %v351_v21 = vpop.f32.mrf.mxu1 }
 0x1d5   :  { %v323_v33 = vadd.f32 %v322_v20, %v272_v32  ;;  %v352_v34 = vadd.f32 %v351_v21, %v272_v32 }
 0x1d7   :  { %v362_v42 = vmax.f32 %v323_v33, 0.0  ;;  %v363_v43 = vmax.f32 %v352_v34, 0.0 }
 0x1dc   :  { %v325_v22 = vpop.f32.mrf.mxu0  ;;  %v354_v23 = vpop.f32.mrf.mxu1 }
 0x1dd   :  { %v326_v28 = vadd.f32 %v325_v22, %v277_v25  ;;  %v355_v29 = vadd.f32 %v354_v23, %v277_v25 }
 0x1df   :  { %v364_v40 = vmax.f32 %v326_v28, 0.0  ;;  %v365_v41 = vmax.f32 %v355_v29, 0.0 }
 0x1e4   :  { %v328_v26 = vpop.f32.mrf.mxu0  ;;  %v357_v27 = vpop.f32.mrf.mxu1 }
 0x1e5   :  { %v329_v30 = vadd.f32 %v328_v26, %v282_v24  ;;  %v358_v31 = vadd.f32 %v357_v27, %v282_v24 }
 0x1e7   :  { %v366_v35 = vmax.f32 %v329_v30, 0.0  ;;  %v367_v36 = vmax.f32 %v358_v31, 0.0 }
 0x1e9   :  { %560 = vmatpush.msk.msrb.mxu2 %vm67_vm0, %v366_v35  ;;  %565 = vmatpush.msk.msrb.mxu3 %vm67_vm0, %v367_v36 }
 0x1eb   :  { %426 = vmatpush.msrb.mxu2 %v364_v40  ;;  %452 = vmatpush.msrb.mxu3 %v365_v41 }
 0x1ed   :  { %427 = vmatpush.msrb.mxu2 %v362_v42  ;;  %453 = vmatpush.msrb.mxu3 %v363_v43 }
 0x1ef   :  { %428 = vmatpush.msrb.mxu2 %v360_v44  ;;  %454 = vmatpush.msrb.mxu3 %v361_v45 }
 0x1f0   :  { %561 = vmatmul.msk.f32.vlgmr.msrb.gmra.mxu2 %vm54_vm1, %v552_v46  ;;  %566 = vmatmul.msk.f32.vlgmr.msrb.gmra.mxu3 %vm54_vm1, %v552_v46 }
 0x1f8   :  { %562 = vmatmul.msk.f32.gmra.mxu2 %vm54_vm1, %v553_v47  ;;  %567 = vmatmul.msk.f32.gmra.mxu3 %vm54_vm1, %v553_v47 }
 0x200   :  { %563 = vmatmul.msk.f32.gmra.mxu2 %vm54_vm1, %v554_v48  ;;  %568 = vmatmul.msk.f32.gmra.mxu3 %vm54_vm1, %v554_v48 }
 0x208   :  { %564 = vmatmul.msk.f32.gmra.mxu2 %vm54_vm1, %v555_v49  ;;  %569 = vmatmul.msk.f32.gmra.mxu3 %vm54_vm1, %v555_v49 }
 0x273   :  { %v430_v51 = vpop.f32.mrf.mxu2  ;;  %v456_v52 = vpop.f32.mrf.mxu3 }
 0x274   :  { %v457_v53 = vadd.f32 %v456_v52, %v381_v50  ;;  %v431_v54 = vadd.f32 %v430_v51, %v381_v50 }
 0x276   :  { %v467_v55 = vrot.slane %v457_v53, 6 }
 0x278   :  { %v469_v56 = vsel %vm468_vm2, %v431_v54, %v467_v55 }
 0x279   :  { %471 = vst [vmem:[#allocation4] sm:$0xf] %v469_v56 }
 0x27a   :  { %495 = dma.vmem_to_hbm [thread:$0]  %s491_s14, 64, %s493_s17, [#allocation5]  }
 0x27b   :  { %v433_v57 = vpop.f32.mrf.mxu2  ;;  %v459_v58 = vpop.f32.mrf.mxu3 }
 0x283   :  { %v435_v59 = vpop.f32.mrf.mxu2  ;;  %v461_v60 = vpop.f32.mrf.mxu3 }
 0x28b   :  { %v437_v61 = vpop.f32.mrf.mxu2  ;;  %v463_v62 = vpop.f32.mrf.mxu3 }
 0x28c   :  { %626 = dma.done.wait [#allocation3], 1024  }
 0x28d   :  { %627 = vsyncadd [#allocation3], 4294966272 }
 0x28e   :  { %628 = dma.done.wait [#allocation5], 64  }
 0x28f   :  { %629 = vsyncadd [#allocation5], 4294967232 }
 0x290   :  { %504 = vsyncpa [#allocation3], 1 }
 0x291   :  { %505 = vsyncpa [#allocation5], 1 }

</bundles_post_ra>
